<compile_context>
chip_gen: v7x
topology: tpu7x:2x2x1
jax: 0.10.0
libtpu: 0.0.40
codegen_flags: <defaults>
</compile_context>

<pallas_src>
import functools
import math

import jax
import jax.numpy as jnp
from jax.experimental import pallas as pl
from jax.experimental.pallas import tpu as pltpu

BN_EPS = 1e-5


# ------------------------------ Pallas kernel -------------------------------


def _sepconv_kernel(x_ref, wdw_ref, wpw_ref, bias_ref, o_ref, *, row_stride,
                    out_len):
    """Fused depthwise-3x3 + BN + pointwise-1x1 for one image.

    x_ref    : (Cin, L)        zero-padded image, rows flattened at row_stride
    wdw_ref  : (9, Cin, 1)     depthwise taps (BN scale folded), k = 3*dh + dw
    wpw_ref  : (Cout, Cin)     pointwise 1x1 weights
    bias_ref : (Cout, 1)       folded BN shift routed through the pointwise
    o_ref    : (Cout, out_len) output rows, still at row_stride spacing
    """
    xv = x_ref[...]                              # single DMA'd tile per image
    # Depthwise 3x3: accumulate 9 shifted in-VMEM views, scaled per channel
    # (VPU broadcast-MACs; no im2col ever touches HBM).
    acc = wdw_ref[0] * xv[:, 0:out_len]
    for k in range(1, 9):                        # static unroll over the taps
        off = (k // 3) * row_stride + (k % 3)    # tap shift in flattened image
        acc = acc + wdw_ref[k] * xv[:, off:off + out_len]
    # Pointwise 1x1 conv: one lane-dense matmul on the MXU + bias epilogue.
    y = jnp.dot(wpw_ref[...], acc, preferred_element_type=jnp.float32)
    o_ref[...] = (y + bias_ref[...]).astype(o_ref.dtype)


# ------------------------------ kernel wrapper -------------------------------


def separable_conv2d(x, w_dw, w_pw, bn_scale, bn_shift):
    """SeparableConv2d forward (kernel 3, stride 1, 'fixed' pad 1, no bias).

    x        : (N, Cin, H, W) float32 (NCHW, as in PyTorch)
    w_dw     : (Cin, 3, 3)    depthwise weights (groups = Cin)
    w_pw     : (Cout, Cin)    pointwise 1x1 weights
    bn_scale : (Cin,)         gamma / sqrt(running_var + eps)
    bn_shift : (Cin,)         beta - running_mean * bn_scale
    returns  : (N, Cout, H, W)
    """
    n, cin, h, w = x.shape
    cout = w_pw.shape[0]
    hp, wp = h + 2, w + 2                      # fixed_padding: 1 on each side
    out_len = h * wp                           # output rows keep stride wp
    # lane-aligned flattened length; taps read up to 2*wp + 2 past the start
    l = pl.cdiv(hp * wp + 2, 128) * 128

    # Cheap XLA-side prep: pad + flatten only (no tap duplication in HBM).
    xf = jnp.pad(x, ((0, 0), (0, 0), (1, 1), (1, 1))).reshape(n, cin, hp * wp)
    xf = jnp.pad(xf, ((0, 0), (0, 0), (0, l - hp * wp)))

    # Fold BN: scale into the depthwise taps, shift into a pointwise bias.
    wdw_k = jnp.transpose(w_dw * bn_scale[:, None, None], (1, 2, 0))
    wdw_k = wdw_k.reshape(9, cin)[:, :, None]             # (9, Cin, 1)
    bias = (w_pw @ bn_shift)[:, None]                     # (Cout, 1)

    out = pl.pallas_call(
        functools.partial(_sepconv_kernel, row_stride=wp, out_len=out_len),
        out_shape=jax.ShapeDtypeStruct((n, cout, out_len), x.dtype),
        grid=(n,),
        in_specs=[
            pl.BlockSpec((None, cin, l), lambda i: (i, 0, 0)),   # x (per image)
            pl.BlockSpec((9, cin, 1), lambda i: (0, 0, 0)),      # dw taps
            pl.BlockSpec((cout, cin), lambda i: (0, 0)),         # pointwise W
            pl.BlockSpec((cout, 1), lambda i: (0, 0)),           # folded bias
        ],
        out_specs=pl.BlockSpec((None, cout, out_len), lambda i: (i, 0, 0)),
        compiler_params=pltpu.CompilerParams(
            dimension_semantics=("parallel",)),
    )(xf, wdw_k, w_pw, bias)

    # Drop the 2 padded columns per row: (N, Cout, H*Wp) -> (N, Cout, H, W).
    return out.reshape(n, cout, h, wp)[:, :, :, :w]


# --------------------------- parameter initializers --------------------------


def init_separable_conv_params(key, inplanes, planes):
    k1, k2 = jax.random.split(key)
    # torch kaiming_normal_(a=1): gain=1, std = 1/sqrt(fan_in), mode='fan_in'.
    # depthwise conv weight (inplanes, 1, 3, 3): fan_in = 1*3*3 = 9
    w_dw = jax.random.normal(k1, (inplanes, 3, 3), jnp.float32) / math.sqrt(9.0)
    # pointwise conv weight (planes, inplanes, 1, 1): fan_in = inplanes
    w_pw = (jax.random.normal(k2, (planes, inplanes), jnp.float32)
            / math.sqrt(float(inplanes)))
    # BatchNorm2d eval mode: weight=1, bias=0, running_mean=0, running_var=1.
    bn_scale = jnp.full((inplanes,), 1.0 / math.sqrt(1.0 + BN_EPS), jnp.float32)
    bn_shift = jnp.zeros((inplanes,), jnp.float32)
    return w_dw, w_pw, bn_scale, bn_shift


# ------------------------------ pure-JAX reference ---------------------------


def separable_conv2d_reference(x, w_dw, w_pw, bn_scale, bn_shift):
    n, c, h, w = x.shape
    xp = jnp.pad(x, ((0, 0), (0, 0), (1, 1), (1, 1)))
    acc = jnp.zeros((n, c, h, w), jnp.float32)
    for dh in range(3):
        for dw in range(3):
            tap = xp[:, :, dh:dh + h, dw:dw + w]
            acc = acc + w_dw[:, dh, dw][None, :, None, None] * tap
    y = acc * bn_scale[None, :, None, None] + bn_shift[None, :, None, None]
    return jnp.einsum("oc,nchw->nohw", w_pw, y,
                      precision=jax.lax.Precision.HIGHEST)


# ------------------------------------ main ------------------------------------

if __name__ == "__main__":
    key = jax.random.PRNGKey(0)
    kx, kp = jax.random.split(key)

    N, INPLANES, PLANES, H, W = 2, 16, 32, 16, 16
    x = jax.random.normal(kx, (N, INPLANES, H, W), jnp.float32)
    w_dw, w_pw, bn_scale, bn_shift = init_separable_conv_params(
        kp, INPLANES, PLANES)

    fwd = jax.jit(separable_conv2d)
    out = jax.block_until_ready(fwd(x, w_dw, w_pw, bn_scale, bn_shift))

    assert out.shape == (N, PLANES, H, W), out.shape
    assert bool(jnp.all(jnp.isfinite(out)))

    ref = separable_conv2d_reference(x, w_dw, w_pw, bn_scale, bn_shift)
    max_err = float(jnp.max(jnp.abs(out - ref)))
    assert max_err < 1e-1, f"max abs error vs reference: {max_err}"

    print("KERNEL_OK")
</pallas_src>

<mosaic_0001>
module attributes {stable_mosaic.version = 11 : i64} {
  func.func @_sepconv_kernel(%arg0: i32, %arg1: memref<1x16x384xf32, #tpu.memory_space<vmem>>, %arg2: memref<9x16x1xf32, #tpu.memory_space<vmem>>, %arg3: memref<32x16xf32, #tpu.memory_space<vmem>>, %arg4: memref<32x1xf32, #tpu.memory_space<vmem>>, %arg5: memref<1x32x288xf32, #tpu.memory_space<vmem>>) attributes {dimension_semantics = [#tpu.dimension_semantics<parallel>], iteration_bounds = array<i64: 2>, scalar_prefetch = 0 : i64, scratch_operands = 0 : i64, tpu.core_type = #tpu.core_type<tc>, window_params = [{transform_indices = @transform_0, window_bounds = array<i64: 1, 16, 384>}, {pipeline_mode = #tpu.pipeline_mode<synchronous>, transform_indices = @transform_1, window_bounds = array<i64: 9, 16, 1>}, {pipeline_mode = #tpu.pipeline_mode<synchronous>, transform_indices = @transform_2, window_bounds = array<i64: 32, 16>}, {pipeline_mode = #tpu.pipeline_mode<synchronous>, transform_indices = @transform_3, window_bounds = array<i64: 32, 1>}, {transform_indices = @transform_4, window_bounds = array<i64: 1, 32, 288>}]} {
    %c0 = arith.constant 0 : index
    %c0_0 = arith.constant 0 : index
    %c0_1 = arith.constant 0 : index
    %0 = vector.load %arg1[%c0, %c0_0, %c0_1] : memref<1x16x384xf32, #tpu.memory_space<vmem>>, vector<1x16x384xf32>
    %1 = vector.shape_cast %0 : vector<1x16x384xf32> to vector<16x384xf32>
    %c0_2 = arith.constant 0 : index
    %c0_3 = arith.constant 0 : index
    %c0_4 = arith.constant 0 : index
    %2 = vector.load %arg2[%c0_2, %c0_3, %c0_4] : memref<9x16x1xf32, #tpu.memory_space<vmem>>, vector<1x16x1xf32>
    %3 = vector.shape_cast %2 : vector<1x16x1xf32> to vector<16x1xf32>
    %4 = vector.extract_strided_slice %1 {offsets = [0, 0], sizes = [16, 288], strides = [1, 1]} : vector<16x384xf32> to vector<16x288xf32>
    %5 = vector.broadcast %3 : vector<16x1xf32> to vector<16x288xf32>
    %6 = arith.mulf %5, %4 : vector<16x288xf32>
    %c1 = arith.constant 1 : index
    %c0_5 = arith.constant 0 : index
    %c0_6 = arith.constant 0 : index
    %7 = vector.load %arg2[%c1, %c0_5, %c0_6] : memref<9x16x1xf32, #tpu.memory_space<vmem>>, vector<1x16x1xf32>
    %8 = vector.shape_cast %7 : vector<1x16x1xf32> to vector<16x1xf32>
    %9 = vector.extract_strided_slice %1 {offsets = [0, 1], sizes = [16, 288], strides = [1, 1]} : vector<16x384xf32> to vector<16x288xf32>
    %10 = vector.broadcast %8 : vector<16x1xf32> to vector<16x288xf32>
    %11 = arith.mulf %10, %9 : vector<16x288xf32>
    %12 = arith.addf %6, %11 : vector<16x288xf32>
    %c2 = arith.constant 2 : index
    %c0_7 = arith.constant 0 : index
    %c0_8 = arith.constant 0 : index
    %13 = vector.load %arg2[%c2, %c0_7, %c0_8] : memref<9x16x1xf32, #tpu.memory_space<vmem>>, vector<1x16x1xf32>
    %14 = vector.shape_cast %13 : vector<1x16x1xf32> to vector<16x1xf32>
    %15 = vector.extract_strided_slice %1 {offsets = [0, 2], sizes = [16, 288], strides = [1, 1]} : vector<16x384xf32> to vector<16x288xf32>
    %16 = vector.broadcast %14 : vector<16x1xf32> to vector<16x288xf32>
    %17 = arith.mulf %16, %15 : vector<16x288xf32>
    %18 = arith.addf %12, %17 : vector<16x288xf32>
    %c3 = arith.constant 3 : index
    %c0_9 = arith.constant 0 : index
    %c0_10 = arith.constant 0 : index
    %19 = vector.load %arg2[%c3, %c0_9, %c0_10] : memref<9x16x1xf32, #tpu.memory_space<vmem>>, vector<1x16x1xf32>
    %20 = vector.shape_cast %19 : vector<1x16x1xf32> to vector<16x1xf32>
    %21 = vector.extract_strided_slice %1 {offsets = [0, 18], sizes = [16, 288], strides = [1, 1]} : vector<16x384xf32> to vector<16x288xf32>
    %22 = vector.broadcast %20 : vector<16x1xf32> to vector<16x288xf32>
    %23 = arith.mulf %22, %21 : vector<16x288xf32>
    %24 = arith.addf %18, %23 : vector<16x288xf32>
    %c4 = arith.constant 4 : index
    %c0_11 = arith.constant 0 : index
    %c0_12 = arith.constant 0 : index
    %25 = vector.load %arg2[%c4, %c0_11, %c0_12] : memref<9x16x1xf32, #tpu.memory_space<vmem>>, vector<1x16x1xf32>
    %26 = vector.shape_cast %25 : vector<1x16x1xf32> to vector<16x1xf32>
    %27 = vector.extract_strided_slice %1 {offsets = [0, 19], sizes = [16, 288], strides = [1, 1]} : vector<16x384xf32> to vector<16x288xf32>
    %28 = vector.broadcast %26 : vector<16x1xf32> to vector<16x288xf32>
    %29 = arith.mulf %28, %27 : vector<16x288xf32>
    %30 = arith.addf %24, %29 : vector<16x288xf32>
    %c5 = arith.constant 5 : index
    %c0_13 = arith.constant 0 : index
    %c0_14 = arith.constant 0 : index
    %31 = vector.load %arg2[%c5, %c0_13, %c0_14] : memref<9x16x1xf32, #tpu.memory_space<vmem>>, vector<1x16x1xf32>
    %32 = vector.shape_cast %31 : vector<1x16x1xf32> to vector<16x1xf32>
    %33 = vector.extract_strided_slice %1 {offsets = [0, 20], sizes = [16, 288], strides = [1, 1]} : vector<16x384xf32> to vector<16x288xf32>
    %34 = vector.broadcast %32 : vector<16x1xf32> to vector<16x288xf32>
    %35 = arith.mulf %34, %33 : vector<16x288xf32>
    %36 = arith.addf %30, %35 : vector<16x288xf32>
    %c6 = arith.constant 6 : index
    %c0_15 = arith.constant 0 : index
    %c0_16 = arith.constant 0 : index
    %37 = vector.load %arg2[%c6, %c0_15, %c0_16] : memref<9x16x1xf32, #tpu.memory_space<vmem>>, vector<1x16x1xf32>
    %38 = vector.shape_cast %37 : vector<1x16x1xf32> to vector<16x1xf32>
    %39 = vector.extract_strided_slice %1 {offsets = [0, 36], sizes = [16, 288], strides = [1, 1]} : vector<16x384xf32> to vector<16x288xf32>
    %40 = vector.broadcast %38 : vector<16x1xf32> to vector<16x288xf32>
    %41 = arith.mulf %40, %39 : vector<16x288xf32>
    %42 = arith.addf %36, %41 : vector<16x288xf32>
    %c7 = arith.constant 7 : index
    %c0_17 = arith.constant 0 : index
    %c0_18 = arith.constant 0 : index
    %43 = vector.load %arg2[%c7, %c0_17, %c0_18] : memref<9x16x1xf32, #tpu.memory_space<vmem>>, vector<1x16x1xf32>
    %44 = vector.shape_cast %43 : vector<1x16x1xf32> to vector<16x1xf32>
    %45 = vector.extract_strided_slice %1 {offsets = [0, 37], sizes = [16, 288], strides = [1, 1]} : vector<16x384xf32> to vector<16x288xf32>
    %46 = vector.broadcast %44 : vector<16x1xf32> to vector<16x288xf32>
    %47 = arith.mulf %46, %45 : vector<16x288xf32>
    %48 = arith.addf %42, %47 : vector<16x288xf32>
    %c8 = arith.constant 8 : index
    %c0_19 = arith.constant 0 : index
    %c0_20 = arith.constant 0 : index
    %49 = vector.load %arg2[%c8, %c0_19, %c0_20] : memref<9x16x1xf32, #tpu.memory_space<vmem>>, vector<1x16x1xf32>
    %50 = vector.shape_cast %49 : vector<1x16x1xf32> to vector<16x1xf32>
    %51 = vector.extract_strided_slice %1 {offsets = [0, 38], sizes = [16, 288], strides = [1, 1]} : vector<16x384xf32> to vector<16x288xf32>
    %52 = vector.broadcast %50 : vector<16x1xf32> to vector<16x288xf32>
    %53 = arith.mulf %52, %51 : vector<16x288xf32>
    %54 = arith.addf %48, %53 : vector<16x288xf32>
    %c0_21 = arith.constant 0 : index
    %c0_22 = arith.constant 0 : index
    %55 = vector.load %arg3[%c0_21, %c0_22] : memref<32x16xf32, #tpu.memory_space<vmem>>, vector<32x16xf32>
    %cst = arith.constant dense<0.000000e+00> : vector<32x288xf32>
    %56 = tpu.matmul %55, %54, %cst {dimension_numbers = #tpu.dot_dimension_numbers<[1], [0], [0], [1], [0, 0, 1, 1], [], []>} : vector<32x16xf32>, vector<16x288xf32>, vector<32x288xf32> -> vector<32x288xf32>
    %c0_23 = arith.constant 0 : index
    %c0_24 = arith.constant 0 : index
    %57 = vector.load %arg4[%c0_23, %c0_24] : memref<32x1xf32, #tpu.memory_space<vmem>>, vector<32x1xf32>
    %58 = vector.broadcast %57 : vector<32x1xf32> to vector<32x288xf32>
    %59 = arith.addf %56, %58 : vector<32x288xf32>
    %c0_25 = arith.constant 0 : index
    %c0_26 = arith.constant 0 : index
    %c0_27 = arith.constant 0 : index
    %60 = vector.load %arg5[%c0_25, %c0_26, %c0_27] : memref<1x32x288xf32, #tpu.memory_space<vmem>>, vector<1x32x288xf32>
    %61 = vector.shape_cast %60 : vector<1x32x288xf32> to vector<32x288xf32>
    %62 = vector.shape_cast %59 : vector<32x288xf32> to vector<1x32x288xf32>
    tpu.vector_store %arg5[%c0_25, %c0_26, %c0_27], %62 {strides = array<i32>} : memref<1x32x288xf32, #tpu.memory_space<vmem>>, vector<1x32x288xf32>,
    return
  }
  func.func @transform_0(%arg0: i32) -> (i32, i32, i32) {
    %c0_i32 = arith.constant 0 : i32
    %c0_i32_0 = arith.constant 0 : i32
    %c0_i32_1 = arith.constant 0 : i32
    return %arg0, %c0_i32, %c0_i32_0 : i32, i32, i32
  }
  func.func @transform_1(%arg0: i32) -> (i32, i32, i32) {
    %c0_i32 = arith.constant 0 : i32
    %c0_i32_0 = arith.constant 0 : i32
    %c0_i32_1 = arith.constant 0 : i32
    %c0_i32_2 = arith.constant 0 : i32
    return %c0_i32, %c0_i32_0, %c0_i32_1 : i32, i32, i32
  }
  func.func @transform_2(%arg0: i32) -> (i32, i32) {
    %c0_i32 = arith.constant 0 : i32
    %c0_i32_0 = arith.constant 0 : i32
    %c0_i32_1 = arith.constant 0 : i32
    return %c0_i32, %c0_i32_0 : i32, i32
  }
  func.func @transform_3(%arg0: i32) -> (i32, i32) {
    %c0_i32 = arith.constant 0 : i32
    %c0_i32_0 = arith.constant 0 : i32
    %c0_i32_1 = arith.constant 0 : i32
    return %c0_i32, %c0_i32_0 : i32, i32
  }
  func.func @transform_4(%arg0: i32) -> (i32, i32, i32) {
    %c0_i32 = arith.constant 0 : i32
    %c0_i32_0 = arith.constant 0 : i32
    %c0_i32_1 = arith.constant 0 : i32
    return %arg0, %c0_i32, %c0_i32_0 : i32, i32, i32
  }
}

</mosaic_0001>

<bundles_post_ra>
// kernel: separable_conv2d.1
= control target key start
LH: loop header
LB: loop body
LE: loop exit
PB: predicated region body
PF: predicated region fallthrough
CT: control target
= control target key end

     0   :  { %s1061_s15 = smov 0   ;;  %s1284_s0 = inlined_call_operand.vmem [shape: f32[2,16,384], index: 0, kind: input, shape index: {}]   ;;  %s1285_s1 = inlined_call_operand.vmem [shape: f32[9,16,1], index: 1, kind: input, shape index: {}]   ;;  %s1286_s2 = inlined_call_operand.vmem [shape: f32[32,16], index: 2, kind: input, shape index: {}]   ;;  %s1287_s3 = inlined_call_operand.vmem [shape: f32[32,1], index: 3, kind: input, shape index: {}]   ;;  %s1288_s4 = inlined_call_operand.vmem [shape: f32[2,32,288], index: 4, kind: output, shape index: {}]  }
   0x1 LB: > { %s937_s16 = sadd.s32 4294967295, %s1024_s15   ;;  %p941_p0 = scmp.ge.s32.totalorder %s1024_s15, 1  ;;  %s1024_s15 = sphi %s1061_s15, %s14_s15  }
   0x2   : > { %p162_p1 = scmp.lt.s32.totalorder %s1024_s15, 3 }
   0x4   : > { %p163_p2 = pnand %p941_p0, %p162_p1 }
   0x5   : > { %v946_v0 = vld [vmem:[%s1285_s1 + $0x20] sm:$0xff] (!%p163_p2)  ;;  %v944_v1 = vld [vmem:[%s1285_s1 + $0x10] sm:$0xff] (!%p163_p2)  ;;  %v1026_v2 = vmov (!%p163_p2), 0   ;;  %v947_v3 = vld [vmem:[%s1285_s1 + $0x28] sm:$0xff] (!%p163_p2)  ;;  %p188_p3 = scmp.lt.s32.totalorder (!%p163_p2), %s937_s16, 1  ;;  %s1027_s7 = smov (!%p163_p2), 127  }
   0x6   : > { %166 = sbr.rel (%p163_p2) target bundleno = 576 (0x240), region = 36  ;;  %1017 = vset.pattern.permute.xlu1 (!%p163_p2), %v1026_v2  ;;  %1016 = vset.pattern.permute.xlu0 (!%p163_p2), %v1026_v2  ;;  %v945_v4 = vld [vmem:[%s1285_s1 + $0x18] sm:$0xff] (!%p163_p2)  ;;  %v948_v6 = vld [vmem:[%s1285_s1 + $0x30] sm:$0xff] (!%p163_p2)  ;;  %v951_v7 = vld [vmem:[%s1285_s1 + $0x48] sm:$0xff] (!%p163_p2)  ;;  %s1028_s8 = smov (!%p163_p2), 126   ;;  %vm259_vm0 = vcmask (!%p163_p2), 1039360  }
   0x7   : > { %281 = vperm.xlu1 (!%p163_p2), %1017, %v946_v0   ;;  %227 = vperm.xlu0 (!%p163_p2), %1016, %v944_v1   ;;  %v949_v5 = vld [vmem:[%s1285_s1 + $0x38] sm:$0xff] (!%p163_p2)  ;;  %v950_v8 = vld [vmem:[%s1285_s1 + $0x40] sm:$0xff] (!%p163_p2)  ;;  %v952_v10 = vld [vmem:[%s1285_s1 + $0x50] sm:$0xff] (!%p163_p2)  ;;  %s1029_s9 = smov (!%p163_p2), 110   ;;  %s1030_s10 = smov (!%p163_p2), 109   ;;  %vm313_vm1 = vcmask (!%p163_p2), 1031168  }
   0x8   : > { %v953_v9 = vld [vmem:[%s1285_s1 + $0x58] sm:$0xff] (!%p163_p2)  ;;  %v955_v11 = vld [vmem:[%s1285_s1 + $0x68] sm:$0xff] (!%p163_p2)  ;;  %v954_v12 = vld [vmem:[%s1285_s1 + $0x60] sm:$0xff] (!%p163_p2)  ;;  %s1031_s11 = smov (!%p163_p2), 108   ;;  %s1032_s12 = smov (!%p163_p2), 92   ;;  %vm367_vm2 = vcmask (!%p163_p2), 900096  }
   0x9   : > { %v957_v13 = vld [vmem:[%s1285_s1 + $0x78] sm:$0xff] (!%p163_p2)  ;;  %v956_v14 = vld [vmem:[%s1285_s1 + $0x70] sm:$0xff] (!%p163_p2)  ;;  %v959_v15 = vld [vmem:[%s1285_s1 + $0x88] sm:$0xff] (!%p163_p2)  ;;  %s1033_s13 = smov (!%p163_p2), 91   ;;  %s1034_s14 = smov (!%p163_p2), 90   ;;  %vm421_vm3 = vcmask (!%p163_p2), 891904  }
   0xa   : > { %v958_v16 = vld [vmem:[%s1285_s1 + $0x80] sm:$0xff] (!%p163_p2)  ;;  %v205_v17 = vld [vmem:[%s1285_s1 + $0x8] sm:$0xff] (!%p163_p2)  ;;  %vm475_vm4 = vcmask (!%p163_p2), 883712   ;;  %vm529_vm5 = vcmask (!%p163_p2), 752640   ;;  %vm583_vm6 = vcmask (!%p163_p2), 744448   ;;  %vm637_vm7 = vcmask (!%p163_p2), 736256  }
   0xb   : > { %286 = vperm.xlu1 (!%p163_p2), %1017, %v947_v3   ;;  %232 = vperm.xlu0 (!%p163_p2), %1016, %v945_v4   ;;  %v204_v18 = vld [vmem:[%s1285_s1] sm:$0xff] (!%p163_p2)  ;;  %vm682_vm8 = vcmask (!%p163_p2), 130048   ;;  %vm871_vm9 = vcmask (!%p163_p2), 261120  }
   0xd   : > { %s1290_s16 = smov (!%p188_p3, %s937_s16), 1 }
   0xe   : > { %s996_s29 = smul.u32 48, %s1290_s16 }
   0xf   : > { %340 = vperm.xlu1 %1017, %v949_v5   ;;  %335 = vperm.xlu0 %1016, %v948_v6  }
  0x10   : > { %s192_s6 = scalar_lea.vmem %s1284_s0, %s996_s29 }
  0x11   : > { %v1133_v19 = vld [vmem:[%s192_s6 + $0x8] sm:$0xff]  ;;  %v1135_v20 = vld [vmem:[%s192_s6 + $0x10] sm:$0xff]  ;;  %v1139_v24 = vld [vmem:[%s192_s6 + $0x20] sm:$0xff] }
  0x12   : > { %v1141_v25 = vld [vmem:[%s192_s6 + $0x28] sm:$0xff]  ;;  %v1145_v29 = vld [vmem:[%s192_s6] sm:$0xff]  ;;  %v1147_v30 = vld [vmem:[%s192_s6 + $0x18] sm:$0xff] }
  0x13   : > { %394 = vperm.xlu1 %1017, %v951_v7   ;;  %389 = vperm.xlu0 %1016, %v950_v8  }
  0x17   : > { %448 = vperm.xlu1 %1017, %v953_v9   ;;  %443 = vperm.xlu0 %1016, %v952_v10  }
  0x1b   : > { %502 = vperm.xlu1 %1017, %v955_v11   ;;  %497 = vperm.xlu0 %1016, %v954_v12  }
  0x1f   : > { %556 = vperm.xlu1 %1017, %v957_v13   ;;  %551 = vperm.xlu0 %1016, %v956_v14  }
  0x23   : > { %610 = vperm.xlu1 %1017, %v959_v15   ;;  %605 = vperm.xlu0 %1016, %v958_v16  }
  0x27   : > { %213 = vperm.xlu1 %1017, %v205_v17   ;;  %208 = vperm.xlu0 %1016, %v204_v18  }
  0x86   : > { %v228_v21 = vpop.permute.xlu0 %227  ;;  %v282_v33 = vpop.permute.xlu1 %281 }
  0x87   : > { %v236_v22 = vmul.f32 %v228_v21, %v1133_v19  ;;  %v237_v23 = vmul.f32 %v228_v21, %v1135_v20  ;;  %v235_v31 = vmul.f32 %v228_v21, %v1145_v29  ;;  %v290_v34 = vmul.f32 %v282_v33, %v1133_v19 }
  0x88   : > { %v291_v35 = vmul.f32 %v282_v33, %v1135_v20  ;;  %v289_v39 = vmul.f32 %v282_v33, %v1145_v29  ;;  %v658_v33 = vld [vmem:[%s1287_s3] sm:$0xff] }
  0x89   : > { %251 = vrot.lane.b32.xlu1 %v237_v23, %s1027_s7  ;;  %249 = vrot.lane.b32.xlu0 %v236_v22, %s1027_s7 }
  0x8a   : > { %v233_v26 = vpop.permute.xlu0 %232  ;;  %v287_v36 = vpop.permute.xlu1 %286 }
  0x8b   : > { %v239_v27 = vmul.f32 %v233_v26, %v1139_v24  ;;  %v240_v28 = vmul.f32 %v233_v26, %v1141_v25  ;;  %v238_v32 = vmul.f32 %v233_v26, %v1147_v30  ;;  %v293_v37 = vmul.f32 %v287_v36, %v1139_v24 }
  0x8c   : > { %v294_v38 = vmul.f32 %v287_v36, %v1141_v25  ;;  %v292_v40 = vmul.f32 %v287_v36, %v1147_v30 }
  0x8d   : > { %257 = vrot.lane.b32.xlu1 %v240_v28, %s1027_s7  ;;  %255 = vrot.lane.b32.xlu0 %v239_v27, %s1027_s7  ;;  %v1035_v27 = vmov 0.0  }
  0x8e   : > { %v336_v41 = vpop.permute.xlu0 %335  ;;  %v341_v44 = vpop.permute.xlu1 %340  ;;  %759 = vmatprep.mubr.f32.mxu0 %v1035_v27  ;;  %777 = vmatprep.mubr.f32.mxu1 %v1035_v27 }
  0x8f   : > { %v344_v42 = vmul.f32 %v336_v41, %v1133_v19  ;;  %v345_v43 = vmul.f32 %v336_v41, %v1135_v20  ;;  %v347_v45 = vmul.f32 %v341_v44, %v1139_v24  ;;  %v348_v46 = vmul.f32 %v341_v44, %v1141_v25 }
  0x90   : > { %v346_v47 = vmul.f32 %v341_v44, %v1147_v30  ;;  %v343_v48 = vmul.f32 %v336_v41, %v1145_v29 }
  0x91   : > { %253 = vrot.lane.b32.xlu1 %v238_v32, %s1027_s7  ;;  %247 = vrot.lane.b32.xlu0 %v235_v31, %s1027_s7  ;;  %v659_v32 = vld [vmem:[%s1287_s3 + $0x8] sm:$0xff]  ;;  %s997_s7 = smul.u32 96, %s1290_s16 }
  0x92   : > { %v390_v49 = vpop.permute.xlu0 %389  ;;  %v395_v52 = vpop.permute.xlu1 %394 }
  0x93   : > { %v398_v50 = vmul.f32 %v390_v49, %v1133_v19  ;;  %v399_v51 = vmul.f32 %v390_v49, %v1135_v20  ;;  %v401_v53 = vmul.f32 %v395_v52, %v1139_v24  ;;  %v402_v54 = vmul.f32 %v395_v52, %v1141_v25 }
  0x94   : > { %v400_v55 = vmul.f32 %v395_v52, %v1147_v30  ;;  %v397_v56 = vmul.f32 %v390_v49, %v1145_v29 }
  0x95   : > { %305 = vrot.lane.b32.xlu1 %v291_v35, %s1028_s8  ;;  %303 = vrot.lane.b32.xlu0 %v290_v34, %s1028_s8  ;;  %v661_v34 = vld [vmem:[%s1287_s3 + $0x18] sm:$0xff]  ;;  %v660_v35 = vld [vmem:[%s1287_s3 + $0x10] sm:$0xff] }
  0x96   : > { %v444_v57 = vpop.permute.xlu0 %443  ;;  %v449_v60 = vpop.permute.xlu1 %448 }
  0x97   : > { %v452_v58 = vmul.f32 %v444_v57, %v1133_v19  ;;  %v453_v59 = vmul.f32 %v444_v57, %v1135_v20  ;;  %v455_v61 = vmul.f32 %v449_v60, %v1139_v24  ;;  %v456_v62 = vmul.f32 %v449_v60, %v1141_v25 }
  0x98   : > { %v454_v63 = vmul.f32 %v449_v60, %v1147_v30  ;;  %v451_v0 = vmul.f32 %v444_v57, %v1145_v29 }
  0x99   : > { %311 = vrot.lane.b32.xlu1 %v294_v38, %s1028_s8  ;;  %309 = vrot.lane.b32.xlu0 %v293_v37, %s1028_s8 }
  0x9a   : > { %v498_v1 = vpop.permute.xlu0 %497  ;;  %v503_v4 = vpop.permute.xlu1 %502 }
  0x9b   : > { %v506_v2 = vmul.f32 %v498_v1, %v1133_v19  ;;  %v507_v3 = vmul.f32 %v498_v1, %v1135_v20  ;;  %v509_v5 = vmul.f32 %v503_v4, %v1139_v24  ;;  %v510_v6 = vmul.f32 %v503_v4, %v1141_v25 }
  0x9c   : > { %v508_v7 = vmul.f32 %v503_v4, %v1147_v30  ;;  %v505_v8 = vmul.f32 %v498_v1, %v1145_v29 }
  0x9d   : > { %307 = vrot.lane.b32.xlu1 %v292_v40, %s1028_s8  ;;  %301 = vrot.lane.b32.xlu0 %v289_v39, %s1028_s8 }
  0x9e   : > { %v552_v9 = vpop.permute.xlu0 %551  ;;  %v557_v12 = vpop.permute.xlu1 %556 }
  0x9f   : > { %v560_v10 = vmul.f32 %v552_v9, %v1133_v19  ;;  %v561_v11 = vmul.f32 %v552_v9, %v1135_v20  ;;  %v563_v13 = vmul.f32 %v557_v12, %v1139_v24  ;;  %v564_v14 = vmul.f32 %v557_v12, %v1141_v25 }
  0xa0   : > { %v562_v15 = vmul.f32 %v557_v12, %v1147_v30  ;;  %v559_v16 = vmul.f32 %v552_v9, %v1145_v29 }
  0xa1   : > { %359 = vrot.lane.b32.xlu1 %v345_v43, %s1029_s9  ;;  %357 = vrot.lane.b32.xlu0 %v344_v42, %s1029_s9 }
  0xa2   : > { %v606_v17 = vpop.permute.xlu0 %605  ;;  %v611_v22 = vpop.permute.xlu1 %610 }
  0xa3   : > { %v614_v18 = vmul.f32 %v606_v17, %v1133_v19  ;;  %v615_v21 = vmul.f32 %v606_v17, %v1135_v20  ;;  %v617_v23 = vmul.f32 %v611_v22, %v1139_v24  ;;  %v618_v26 = vmul.f32 %v611_v22, %v1141_v25 }
  0xa4   : > { %v616_v28 = vmul.f32 %v611_v22, %v1147_v30  ;;  %v613_v31 = vmul.f32 %v606_v17, %v1145_v29 }
  0xa5   : > { %365 = vrot.lane.b32.xlu1 %v348_v46, %s1029_s9  ;;  %363 = vrot.lane.b32.xlu0 %v347_v45, %s1029_s9 }
  0xa6   : > { %v214_v36 = vpop.permute.xlu1 %213  ;;  %v209_v37 = vpop.permute.xlu0 %208 }
  0xa7   : > { %v218_v38 = vmul.f32 %v209_v37, %v1135_v20  ;;  %v217_v39 = vmul.f32 %v209_v37, %v1133_v19  ;;  %v221_v45 = vmul.f32 %v214_v36, %v1141_v25  ;;  %v220_v46 = vmul.f32 %v214_v36, %v1139_v24 }
  0xa8   : > { %v219_v20 = vmul.f32 %v214_v36, %v1147_v30  ;;  %v216_v19 = vmul.f32 %v209_v37, %v1145_v29 }
  0xa9   : > { %361 = vrot.lane.b32.xlu1 %v346_v47, %s1029_s9  ;;  %355 = vrot.lane.b32.xlu0 %v343_v48, %s1029_s9 }
  0xad   : > { %413 = vrot.lane.b32.xlu1 %v399_v51, %s1030_s10  ;;  %411 = vrot.lane.b32.xlu0 %v398_v50, %s1030_s10 }
  0xb1   : > { %419 = vrot.lane.b32.xlu1 %v402_v54, %s1030_s10  ;;  %417 = vrot.lane.b32.xlu0 %v401_v53, %s1030_s10 }
  0xb5   : > { %415 = vrot.lane.b32.xlu1 %v400_v55, %s1030_s10  ;;  %409 = vrot.lane.b32.xlu0 %v397_v56, %s1030_s10  ;;  %s1263_s10 = scalar_lea.vmem %s1288_s4, %s997_s7 }
  0xb9   : > { %467 = vrot.lane.b32.xlu1 %v453_v59, %s1031_s11  ;;  %465 = vrot.lane.b32.xlu0 %v452_v58, %s1031_s11 }
  0xbd   : > { %473 = vrot.lane.b32.xlu1 %v456_v62, %s1031_s11  ;;  %471 = vrot.lane.b32.xlu0 %v455_v61, %s1031_s11 }
  0xc1   : > { %469 = vrot.lane.b32.xlu1 %v454_v63, %s1031_s11  ;;  %463 = vrot.lane.b32.xlu0 %v451_v0, %s1031_s11 }
  0xc5   : > { %521 = vrot.lane.b32.xlu1 %v507_v3, %s1032_s12  ;;  %519 = vrot.lane.b32.xlu0 %v506_v2, %s1032_s12 }
  0xc9   : > { %527 = vrot.lane.b32.xlu1 %v510_v6, %s1032_s12  ;;  %525 = vrot.lane.b32.xlu0 %v509_v5, %s1032_s12 }
  0xcd   : > { %523 = vrot.lane.b32.xlu1 %v508_v7, %s1032_s12  ;;  %517 = vrot.lane.b32.xlu0 %v505_v8, %s1032_s12 }
  0xd1   : > { %575 = vrot.lane.b32.xlu1 %v561_v11, %s1033_s13  ;;  %573 = vrot.lane.b32.xlu0 %v560_v10, %s1033_s13 }
  0xd5   : > { %581 = vrot.lane.b32.xlu1 %v564_v14, %s1033_s13  ;;  %579 = vrot.lane.b32.xlu0 %v563_v13, %s1033_s13 }
  0xd9   : > { %577 = vrot.lane.b32.xlu1 %v562_v15, %s1033_s13  ;;  %571 = vrot.lane.b32.xlu0 %v559_v16, %s1033_s13 }
  0xdd   : > { %629 = vrot.lane.b32.xlu1 %v615_v21, %s1034_s14  ;;  %627 = vrot.lane.b32.xlu0 %v614_v18, %s1034_s14 }
  0xe1   : > { %635 = vrot.lane.b32.xlu1 %v618_v26, %s1034_s14  ;;  %633 = vrot.lane.b32.xlu0 %v617_v23, %s1034_s14 }
  0xe5   : > { %631 = vrot.lane.b32.xlu1 %v616_v28, %s1034_s14  ;;  %625 = vrot.lane.b32.xlu0 %v613_v31, %s1034_s14 }
  0xe9   : > { %669 = vperm.xlu1 %1017, %v659_v32   ;;  %664 = vperm.xlu0 %1016, %v658_v33  }
  0xed   : > { %679 = vperm.xlu1 %1017, %v661_v34   ;;  %674 = vperm.xlu0 %1016, %v660_v35  }
  0xfb   : > { %v252_v40 = vpop.permute.xlu1 %251  ;;  %v250_v41 = vpop.permute.xlu0 %249 }
  0xfc   : > { %v272_v42 = vadd.f32 %v252_v40, %v218_v38  ;;  %v261_v43 = vsel %vm259_vm0, %v250_v41, %v252_v40 }
  0xfd   : > { %v271_v44 = vadd.f32 %v261_v43, %v217_v39 }
  0xff   : > { %v258_v47 = vpop.permute.xlu1 %257  ;;  %v256_v48 = vpop.permute.xlu0 %255 }
 0x100   : > { %v275_v49 = vadd.f32 %v258_v47, %v221_v45  ;;  %v263_v50 = vsel %vm259_vm0, %v256_v48, %v258_v47 }
 0x101   : > { %v274_v51 = vadd.f32 %v263_v50, %v220_v46 }
 0x103   : > { %v254_v52 = vpop.permute.xlu1 %253  ;;  %v248_v53 = vpop.permute.xlu0 %247 }
 0x104   : > { %v262_v54 = vsel %vm259_vm0, %v254_v52, %v256_v48  ;;  %v260_v55 = vsel %vm259_vm0, %v248_v53, %v250_v41 }
 0x105   : > { %v273_v56 = vadd.f32 %v262_v54, %v219_v20  ;;  %v270_v25 = vadd.f32 %v260_v55, %v216_v19 }
 0x107   : > { %v306_v24 = vpop.permute.xlu1 %305  ;;  %v304_v57 = vpop.permute.xlu0 %303 }
 0x108   : > { %v326_v58 = vadd.f32 %v306_v24, %v272_v42  ;;  %v315_v59 = vsel %vm313_vm1, %v304_v57, %v306_v24 }
 0x109   : > { %v325_v60 = vadd.f32 %v315_v59, %v271_v44 }
 0x10b   : > { %v312_v61 = vpop.permute.xlu1 %311  ;;  %v310_v62 = vpop.permute.xlu0 %309 }
 0x10c   : > { %v329_v30 = vadd.f32 %v312_v61, %v275_v49  ;;  %v317_v37 = vsel %vm313_vm1, %v310_v62, %v312_v61 }
 0x10d   : > { %v328_v44 = vadd.f32 %v317_v37, %v274_v51 }
 0x10f   : > { %v308_v63 = vpop.permute.xlu1 %307  ;;  %v302_v29 = vpop.permute.xlu0 %301 }
 0x110   : > { %v316_v0 = vsel %vm313_vm1, %v308_v63, %v310_v62  ;;  %v314_v1 = vsel %vm313_vm1, %v302_v29, %v304_v57 }
 0x111   : > { %v327_v2 = vadd.f32 %v316_v0, %v273_v56  ;;  %v324_v3 = vadd.f32 %v314_v1, %v270_v25 }
 0x113   : > { %v360_v4 = vpop.permute.xlu1 %359  ;;  %v358_v5 = vpop.permute.xlu0 %357 }
 0x114   : > { %v369_v38 = vsel %vm367_vm2, %v358_v5, %v360_v4  ;;  %v380_v45 = vadd.f32 %v360_v4, %v326_v58 }
 0x115   : > { %v379_v46 = vadd.f32 %v369_v38, %v325_v60 }
 0x117   : > { %v366_v6 = vpop.permute.xlu1 %365  ;;  %v364_v7 = vpop.permute.xlu0 %363 }
 0x118   : > { %v371_v41 = vsel %vm367_vm2, %v364_v7, %v366_v6  ;;  %v383_v47 = vadd.f32 %v366_v6, %v329_v30 }
 0x119   : > { %v382_v20 = vadd.f32 %v371_v41, %v328_v44 }
 0x11b   : > { %v362_v8 = vpop.permute.xlu1 %361  ;;  %v356_v9 = vpop.permute.xlu0 %355 }
 0x11c   : > { %v370_v42 = vsel %vm367_vm2, %v362_v8, %v364_v7  ;;  %v368_v43 = vsel %vm367_vm2, %v356_v9, %v358_v5 }
 0x11d   : > { %v381_v19 = vadd.f32 %v370_v42, %v327_v2  ;;  %v378_v52 = vadd.f32 %v368_v43, %v324_v3 }
 0x11f   : > { %v414_v10 = vpop.permute.xlu1 %413  ;;  %v412_v11 = vpop.permute.xlu0 %411 }
 0x120   : > { %v423_v48 = vsel %vm421_vm3, %v412_v11, %v414_v10  ;;  %v434_v53 = vadd.f32 %v414_v10, %v380_v45 }
 0x121   : > { %v433_v57 = vadd.f32 %v423_v48, %v379_v46 }
 0x123   : > { %v420_v12 = vpop.permute.xlu1 %419  ;;  %v418_v13 = vpop.permute.xlu0 %417 }
 0x124   : > { %v425_v49 = vsel %vm421_vm3, %v418_v13, %v420_v12  ;;  %v437_v56 = vadd.f32 %v420_v12, %v383_v47 }
 0x125   : > { %v436_v58 = vadd.f32 %v425_v49, %v382_v20  ;;  %v654_v49 = vld [vmem:[%s1286_s2] sm:$0xff]  ;;  %v655_v20 = vld [vmem:[%s1286_s2 + $0x8] sm:$0xff] }
 0x127   : > { %v416_v14 = vpop.permute.xlu1 %415  ;;  %v410_v15 = vpop.permute.xlu0 %409 }
 0x128   : > { %v424_v50 = vsel %vm421_vm3, %v416_v14, %v418_v13  ;;  %v422_v25 = vsel %vm421_vm3, %v410_v15, %v412_v11 }
 0x129   : > { %v435_v59 = vadd.f32 %v424_v50, %v381_v19  ;;  %v432_v29 = vadd.f32 %v422_v25, %v378_v52  ;;  %v657_v50 = vld [vmem:[%s1286_s2 + $0x18] sm:$0xff]  ;;  %v656_v19 = vld [vmem:[%s1286_s2 + $0x10] sm:$0xff] }
 0x12b   : > { %v468_v16 = vpop.permute.xlu1 %467  ;;  %v466_v17 = vpop.permute.xlu0 %465 }
 0x12c   : > { %v477_v51 = vsel %vm475_vm4, %v466_v17, %v468_v16  ;;  %v488_v60 = vadd.f32 %v468_v16, %v434_v53 }
 0x12d   : > { %v487_v0 = vadd.f32 %v477_v51, %v433_v57 }
 0x12f   : > { %v474_v18 = vpop.permute.xlu1 %473  ;;  %v472_v21 = vpop.permute.xlu0 %471 }
 0x130   : > { %v479_v24 = vsel %vm475_vm4, %v472_v21, %v474_v18  ;;  %v491_v61 = vadd.f32 %v474_v18, %v437_v56 }
 0x131   : > { %v490_v1 = vadd.f32 %v479_v24, %v436_v58 }
 0x133   : > { %v470_v22 = vpop.permute.xlu1 %469  ;;  %v464_v23 = vpop.permute.xlu0 %463 }
 0x134   : > { %v478_v62 = vsel %vm475_vm4, %v470_v22, %v472_v21  ;;  %v476_v2 = vsel %vm475_vm4, %v464_v23, %v466_v17 }
 0x135   : > { %v489_v9 = vadd.f32 %v478_v62, %v435_v59  ;;  %v486_v17 = vadd.f32 %v476_v2, %v432_v29 }
 0x137   : > { %v522_v26 = vpop.permute.xlu1 %521  ;;  %v520_v28 = vpop.permute.xlu0 %519 }
 0x138   : > { %v531_v30 = vsel %vm529_vm5, %v520_v28, %v522_v26  ;;  %v542_v5 = vadd.f32 %v522_v26, %v488_v60 }
 0x139   : > { %v541_v10 = vadd.f32 %v531_v30, %v487_v0 }
 0x13b   : > { %v528_v31 = vpop.permute.xlu1 %527  ;;  %v526_v32 = vpop.permute.xlu0 %525 }
 0x13c   : > { %v533_v63 = vsel %vm529_vm5, %v526_v32, %v528_v31  ;;  %v545_v6 = vadd.f32 %v528_v31, %v491_v61 }
 0x13d   : > { %v544_v11 = vadd.f32 %v533_v63, %v490_v1 }
 0x13f   : > { %v524_v33 = vpop.permute.xlu1 %523  ;;  %v518_v34 = vpop.permute.xlu0 %517 }
 0x140   : > { %v532_v12 = vsel %vm529_vm5, %v524_v33, %v526_v32  ;;  %v530_v13 = vsel %vm529_vm5, %v518_v34, %v520_v28 }
 0x141   : > { %v543_v33 = vadd.f32 %v532_v12, %v489_v9  ;;  %v540_v28 = vadd.f32 %v530_v13, %v486_v17 }
 0x143   : > { %v576_v35 = vpop.permute.xlu1 %575  ;;  %v1220_v36 = vpop.permute.xlu0 %573 }
 0x144   : > { %v585_v7 = vsel %vm583_vm6, %v1220_v36, %v576_v35  ;;  %v596_v14 = vadd.f32 %v576_v35, %v542_v5 }
 0x145   : > { %v595_v18 = vadd.f32 %v585_v7, %v541_v10 }
 0x147   : > { %v582_v39 = vpop.permute.xlu1 %581  ;;  %v580_v40 = vpop.permute.xlu0 %579 }
 0x148   : > { %v587_v8 = vsel %vm583_vm6, %v580_v40, %v582_v39  ;;  %v599_v15 = vadd.f32 %v582_v39, %v545_v6 }
 0x149   : > { %v598_v21 = vadd.f32 %v587_v8, %v544_v11 }
 0x14b   : > { %v578_v54 = vpop.permute.xlu1 %577  ;;  %v572_v55 = vpop.permute.xlu0 %571 }
 0x14c   : > { %v586_v22 = vsel %vm583_vm6, %v578_v54, %v580_v40  ;;  %v584_v31 = vsel %vm583_vm6, %v572_v55, %v1220_v36 }
 0x14d   : > { %v597_v41 = vadd.f32 %v586_v22, %v543_v33  ;;  %v594_v42 = vadd.f32 %v584_v31, %v540_v28 }
 0x14f   : > { %v630_v3 = vpop.permute.xlu1 %629  ;;  %v628_v4 = vpop.permute.xlu0 %627 }
 0x150   : > { %v639_v16 = vsel %vm637_vm7, %v628_v4, %v630_v3  ;;  %v650_v37 = vadd.f32 %v630_v3, %v596_v14 }
 0x151   : > { %v649_v34 = vadd.f32 %v639_v16, %v595_v18 }
 0x153   : > { %v636_v23 = vpop.permute.xlu1 %635  ;;  %v634_v26 = vpop.permute.xlu0 %633 }
 0x154   : > { %v653_v38 = vadd.f32 %v636_v23, %v599_v15  ;;  %v641_v32 = vsel %vm637_vm7, %v634_v26, %v636_v23 }
 0x155   : > { %v652_v35 = vadd.f32 %v641_v32, %v598_v21 }
 0x156   : > { %v990_v39 = vpack.c.bf16 %v653_v38, %v650_v37 }
 0x157   : > { %v632_v43 = vpop.permute.xlu1 %631  ;;  %v626_v44 = vpop.permute.xlu0 %625  ;;  %v986_v45 = vpack.c.bf16 %v652_v35, %v649_v34 }
 0x158   : > { %v640_v40 = vsel %vm637_vm7, %v632_v43, %v634_v26  ;;  %v638_v46 = vsel %vm637_vm7, %v626_v44, %v628_v4 }
 0x159   : > { %v651_v47 = vadd.f32 %v640_v40, %v597_v41  ;;  %v648_v36 = vadd.f32 %v638_v46, %v594_v42  ;;  %987 = vmatprep.subr.bf16.mxu0 %v986_v45  ;;  %994 = vmatprep.subr.bf16.mxu1 %v986_v45 }
 0x15b   : > { %v988_v48 = vpack.c.bf16 %v651_v47, %v648_v36 }
 0x15d   : > { %989 = vmatpush1.bf16.msra.mxu0 %v988_v48  ;;  %995 = vmatpush1.bf16.msra.mxu1 %v988_v48 }
 0x15e   : > { %991 = vmatprep.subr.bf16.mxu1 %v990_v39 }
 0x160   : > { %960 = vmatmul.mubr.msk.f32.vlgmr.msra.gmra.mrb[0].mxu0 %vm682_vm8, %v654_v49  ;;  %963 = vmatmul.mubr.msk.f32.vlgmr.msra.gmra.mrb[0].mxu1 %vm682_vm8, %v657_v50 }
 0x161   : > { %993 = vmatpush3.bf16.msra.mxu1 %v990_v39  ;;  %765 = vmatprep.mubr.f32.mxu0 %v1035_v27 }
 0x162   : > { %980 = vmatprep.mubr.msk.f32.mxu1 %vm682_vm8, %v654_v49 }
 0x164   : > { %961 = vmatmul.mubr.msk.f32.gmra.mrb[2].mxu0 %vm682_vm8, %v655_v20  ;;  %981 = vmatmul.mubr.msk.f32.vlgmr.msra.gmra.mrb[2].mxu1 %vm682_vm8, %v655_v20 }
 0x165   : > { %771 = vmatprep.mubr.f32.mxu0 %v1035_v27  ;;  %983 = vmatprep.mubr.msk.f32.mxu1 %vm682_vm8, %v656_v19 }
 0x168   : > { %962 = vmatmul.mubr.msk.f32.gmra.mrb[4].mxu0 %vm682_vm8, %v656_v19  ;;  %984 = vmatmul.mubr.msk.f32.gmra.mrb[4].mxu1 %vm682_vm8, %v657_v50  ;;  %v670_v52 = vpop.permute.xlu1 %669  ;;  %v665_v53 = vpop.permute.xlu0 %664 }
 0x16c   : > { %v680_v54 = vpop.permute.xlu1 %679  ;;  %v675_v1 = vpop.permute.xlu0 %674 }
 0x233   : > { %v761_v55 = vpop.f32.mrb[0].mxu0  ;;  %v779_v56 = vpop.f32.mrb[0].mxu1 }
 0x234   : > { %v762_v25 = vadd.f32 %v761_v55, %v665_v53  ;;  %v780_v27 = vadd.f32 %v779_v56, %v680_v54  ;;  %v763_v51 = vpop.f32.mrb[1].mxu0  ;;  %v781_v24 = vpop.f32.mrb[1].mxu1 }
 0x235   : > { %v764_v57 = vadd.f32 %v763_v51, %v665_v53  ;;  %v782_v58 = vadd.f32 %v781_v24, %v680_v54 }
 0x236   : > { %869 = vst [vmem:[%s1263_s10] sm:$0xff] %v762_v25  ;;  %879 = vst [vmem:[%s1263_s10 + $0x48] sm:$0xff] %v780_v27 }
 0x237   : > { %870 = vst [vmem:[%s1263_s10 + $0x8] sm:$0xff] %v764_v57  ;;  %880 = vst [vmem:[%s1263_s10 + $0x50] sm:$0xff] %v782_v58  ;;  %v767_v59 = vpop.f32.mrb[2].mxu0  ;;  %v982_v60 = vpop.f32.mrb[2].mxu1 }
 0x238   : > { %v768_v61 = vadd.f32 %v767_v59, %v670_v52  ;;  %v856_v62 = vadd.f32 %v982_v60, %v670_v52  ;;  %v769_v30 = vpop.f32.mrb[3].mxu0  ;;  %v850_v63 = vpop.f32.mrb[3].mxu1 }
 0x239   : > { %v770_v29 = vadd.f32 %v769_v30, %v670_v52  ;;  %v851_v0 = vadd.f32 %v850_v63, %v665_v53 }
 0x23a   : > { %873 = vst [vmem:[%s1263_s10 + $0x18] sm:$0xff] %v768_v61  ;;  %875 = vst.msk [vmem:[%s1263_s10 + $0x28] sm:$0xff] %vm871_vm9, %v856_v62 }
 0x23b   : > { %874 = vst [vmem:[%s1263_s10 + $0x20] sm:$0xff] %v770_v29  ;;  %872 = vst.msk [vmem:[%s1263_s10 + $0x10] sm:$0xff] %vm871_vm9, %v851_v0  ;;  %v773_v2 = vpop.f32.mrb[4].mxu0  ;;  %v985_v3 = vpop.f32.mrb[4].mxu1 }
 0x23c   : > { %v774_v4 = vadd.f32 %v773_v2, %v675_v1  ;;  %v866_v5 = vadd.f32 %v985_v3, %v680_v54  ;;  %v775_v6 = vpop.f32.mrb[5].mxu0  ;;  %v860_v7 = vpop.f32.mrb[5].mxu1 }
 0x23d   : > { %v776_v8 = vadd.f32 %v775_v6, %v675_v1  ;;  %v861_v9 = vadd.f32 %v860_v7, %v675_v1 }
 0x23e   : > { %876 = vst [vmem:[%s1263_s10 + $0x30] sm:$0xff] %v774_v4  ;;  %881 = vst.msk [vmem:[%s1263_s10 + $0x58] sm:$0xff] %vm871_vm9, %v866_v5 }
 0x23f   : > { %877 = vst [vmem:[%s1263_s10 + $0x38] sm:$0xff] %v776_v8  ;;  %878 = vst.msk [vmem:[%s1263_s10 + $0x40] sm:$0xff] %vm871_vm9, %v861_v9 }
 0x240 PF: > { %s14_s15 = sadd.s32 1, %s1024_s15  }
 0x241   : > { %p11_p4 = scmp.ge.s32.totalorder %s14_s15, 4  }
 0x243   :  { %13 = sbr.rel (!%p11_p4) target bundleno = 1 (0x1), region = 74 }

</bundles_post_ra>
